<compile_context>
chip_gen: v6e
topology: v6e:2x2x1
jax: 0.10.0
libtpu: 0.0.40
codegen_flags: <defaults>
</compile_context>

<pallas_src>
import jax
import jax.numpy as jnp
from jax import lax
from jax.experimental import pallas as pl
from jax.experimental.pallas import tpu as pltpu


# Keep full f32 accuracy of the log-prob tables on the MXU (default precision
# would demote f32 matmul operands and break the 1e-4 check vs. the reference).
_PREC = lax.Precision.HIGHEST


# ------------------------------ Pallas kernel -------------------------------

def graphspn_fwd_kernel(x_ref, a_ref, ltx_ref, lta_ref, w1t_ref, w2c_ref, out_ref):
    """Fused one-hot -> leaf -> product -> sum -> root forward for one batch tile.

    x_ref  : (TB, nd_n*nk_n)    f32 flattened node one-hot
    a_ref  : (TB, nd_n^2*nk_e)  f32 flattened edge one-hot
    ltx_ref: (nd_n*nk_n, ni)    f32 node leaf log-probs, contraction-major
    lta_ref: (nd_n^2*nk_e, ni)  f32 edge leaf log-probs, contraction-major
    w1t_ref: (ni, ns)           f32 exp(logw1)^T  (mixture weights, linear space)
    w2c_ref: (ns, 1)            f32 exp(logw2)^T  (root weights, linear space)
    out_ref: (1, TB)            f32 per-sample log-likelihood (lane-dense)
    """
    # Leaf lookup + product node over all nd variables, fused into two MXU
    # contractions: the one-hot selects the category, the sum over variables
    # IS the product node in log space.
    P = jnp.dot(x_ref[...], ltx_ref[...],
                preferred_element_type=jnp.float32, precision=_PREC)
    P = P + jnp.dot(a_ref[...], lta_ref[...],
                    preferred_element_type=jnp.float32, precision=_PREC)  # (TB, ni)

    # Sum (mixture) layer: S[b,s] = logsumexp_i(P[b,i] + logw1[s,i])
    #                            = m[b] + log( exp(P[b,:]-m[b]) @ exp(logw1)^T )
    m1 = jnp.max(P, axis=1, keepdims=True)                                 # (TB, 1)
    S = m1 + jnp.log(jnp.dot(jnp.exp(P - m1), w1t_ref[...],
                             preferred_element_type=jnp.float32,
                             precision=_PREC))                             # (TB, ns)

    # Root mixture, with batch moved onto the lane axis so the store is a
    # single lane-dense row instead of TB masked column stores.
    St = S.T                                                               # (ns, TB)
    m2 = jnp.max(St, axis=0, keepdims=True)                                # (1, TB)
    acc = jnp.sum(jnp.exp(St - m2) * w2c_ref[...], axis=0, keepdims=True)  # (1, TB)
    out_ref[...] = m2 + jnp.log(acc)


# ------------------------------ JAX wrapper ---------------------------------

def _pick_batch_tile(B, tb=None):
    """Batch tile: must divide B and be lane-legal for the (1, TB) output
    (TB % 128 == 0) or be the full batch."""
    def ok(t):
        return (B % t == 0) and (t == B or t % 128 == 0)
    if tb is not None and ok(tb):
        return tb
    for cand in (512, 256, 128):
        if B % cand == 0:
            return cand
    return B  # small / awkward batch: single resident block


def graphspn_forward_pallas(x_oh, a_oh, ltx, lta, w1t, w2c, tb=None):
    B, nd_n, nk_n = x_oh.shape
    nk_e = a_oh.shape[-1]
    kx = nd_n * nk_n
    ka = nd_n * nd_n * nk_e
    ni = ltx.shape[1]
    ns = w1t.shape[1]

    # Trailing-dim collapses: free (metadata-only) reshapes on contiguous arrays.
    x_flat = x_oh.reshape(B, kx)
    a_flat = a_oh.reshape(B, ka)

    tb = _pick_batch_tile(B, tb)
    grid = (B // tb,)

    out = pl.pallas_call(
        graphspn_fwd_kernel,
        out_shape=jax.ShapeDtypeStruct((1, B), jnp.float32),
        grid=grid,
        in_specs=[
            pl.BlockSpec((tb, kx), lambda i: (i, 0)),
            pl.BlockSpec((tb, ka), lambda i: (i, 0)),
            pl.BlockSpec((kx, ni), lambda i: (0, 0)),   # tables: resident across grid
            pl.BlockSpec((ka, ni), lambda i: (0, 0)),
            pl.BlockSpec((ni, ns), lambda i: (0, 0)),
            pl.BlockSpec((ns, 1), lambda i: (0, 0)),
        ],
        out_specs=pl.BlockSpec((1, tb), lambda i: (0, i)),
        compiler_params=pltpu.CompilerParams(
            dimension_semantics=("parallel",),          # megacore-shard the batch loop
            vmem_limit_bytes=48 * 1024 * 1024),         # safe under v7x's 64 MiB VMEM
    )(x_flat, a_flat, ltx, lta, w1t, w2c)

    return out.reshape(B, 1)   # (1, B) -> (B, 1), order-preserving


class GraphSPNZeroCorePallas:
    """Pallas re-implementation of GraphSPNZeroCore.forward semantics."""

    def __init__(self, nd_n, nk_n, nk_e, ns, ni, nl, nr, key):
        self.nd_nodes = nd_n
        self.nk_nodes = nk_n
        self.nk_edges = nk_e
        nd = nd_n + nd_n ** 2
        nk = max(nk_n, nk_e)
        # TODO(synk): nl / nr (binary-tree depth / repetitions) are not modelled.
        k1, k2, k3 = jax.random.split(key, 3)
        # Deterministic synthetic parameters (shapes dictated by __init__ args).
        self.log_theta = jax.nn.log_softmax(
            0.5 * jax.random.normal(k1, (nd, ni, nk), dtype=jnp.float32), axis=-1)
        self.logw1 = jax.nn.log_softmax(
            jax.random.normal(k2, (ns, ni), dtype=jnp.float32), axis=-1)
        self.logw2 = jax.nn.log_softmax(
            jax.random.normal(k3, (1, ns), dtype=jnp.float32), axis=-1)

        # Kernel-side layouts, computed once:
        #  * leaf tables contraction-major (K, ni); node vars use only the first
        #    nk_n categories, edge vars only the first nk_e (the one-hot can never
        #    select the rest), so no category padding is needed and the 25x
        #    nk-on-lane padding of the (nd, ni, nk) layout is gone.
        self.ltx = jnp.transpose(self.log_theta[:nd_n, :, :nk_n], (0, 2, 1)
                                 ).reshape(nd_n * nk_n, ni)
        self.lta = jnp.transpose(self.log_theta[nd_n:, :, :nk_e], (0, 2, 1)
                                 ).reshape(nd_n * nd_n * nk_e, ni)
        #  * mixture / root weights in linear space for the max-trick logsumexp.
        self.w1t = jnp.exp(self.logw1).T                  # (ni, ns)
        self.w2c = jnp.exp(self.logw2).reshape(ns, 1)     # (ns, 1)

    def forward(self, x, a, tb=None):
        # ohe2cat is intentionally skipped for the likelihood path: the one-hot
        # inputs are consumed directly as leaf selectors inside the fused kernel.
        return graphspn_forward_pallas(x, a, self.ltx, self.lta,
                                       self.w1t, self.w2c, tb=tb)

    def logpdf(self, x, a):
        return jnp.mean(self.forward(x, a))


# -------------------------------- reference ---------------------------------

def reference_forward(x_oh, a_oh, log_theta, logw1, logw2):
    B = x_oh.shape[0]
    nd, ni, _ = log_theta.shape
    zx = jnp.argmax(x_oh, axis=2)
    za = jnp.argmax(a_oh, axis=3).reshape(B, -1)
    z = jnp.concatenate([zx, za], axis=1).astype(jnp.int32)        # (B, nd)
    d_idx = jnp.arange(nd)[None, :, None]
    i_idx = jnp.arange(ni)[None, None, :]
    L = log_theta[d_idx, i_idx, z[:, :, None]]                     # (B, nd, ni)
    P = jnp.sum(L, axis=1)                                         # (B, ni)
    S = jax.scipy.special.logsumexp(P[:, None, :] + logw1[None], axis=-1)
    return jax.scipy.special.logsumexp(S + logw2, axis=-1, keepdims=True)


# ---------------------------------- main -------------------------------------

if __name__ == "__main__":
    key = jax.random.PRNGKey(0)
    nd_n, nk_n, nk_e = 4, 5, 4
    ns, ni, nl, nr = 8, 8, 2, 3

    kp, kx1, ka1, kx2, ka2 = jax.random.split(key, 5)
    model = GraphSPNZeroCorePallas(nd_n, nk_n, nk_e, ns, ni, nl, nr, kp)

    # --- tiny batch: single resident block -----------------------------------
    B1 = 2
    x1 = jax.nn.one_hot(jax.random.randint(kx1, (B1, nd_n), 0, nk_n),
                        nk_n, dtype=jnp.float32)                   # (2, 4, 5)
    a1 = jax.nn.one_hot(jax.random.randint(ka1, (B1, nd_n, nd_n), 0, nk_e),
                        nk_e, dtype=jnp.float32)                   # (2, 4, 4, 4)
    out1 = model.forward(x1, a1)
    jax.block_until_ready(out1)
    ref1 = reference_forward(x1, a1, model.log_theta, model.logw1, model.logw2)
    assert out1.shape == (B1, 1)
    assert jnp.allclose(out1, ref1, atol=1e-4, rtol=1e-4), (out1, ref1)

    # --- tiled batch: TB=128, grid=(2,) exercises pipelining + parallel axis ---
    B2 = 256
    x2 = jax.nn.one_hot(jax.random.randint(kx2, (B2, nd_n), 0, nk_n),
                        nk_n, dtype=jnp.float32)
    a2 = jax.nn.one_hot(jax.random.randint(ka2, (B2, nd_n, nd_n), 0, nk_e),
                        nk_e, dtype=jnp.float32)
    out2 = model.forward(x2, a2, tb=128)
    jax.block_until_ready(out2)
    ref2 = reference_forward(x2, a2, model.log_theta, model.logw1, model.logw2)
    assert out2.shape == (B2, 1)
    assert jnp.allclose(out2, ref2, atol=1e-4, rtol=1e-4), \
        float(jnp.max(jnp.abs(out2 - ref2)))

    _ = jax.block_until_ready(model.logpdf(x1, a1))
    print("KERNEL_OK")
</pallas_src>

<mosaic_0001>
module attributes {stable_mosaic.version = 11 : i64} {
  func.func @graphspn_fwd_kernel(%arg0: i32, %arg1: memref<2x20xf32, #tpu.memory_space<vmem>>, %arg2: memref<2x64xf32, #tpu.memory_space<vmem>>, %arg3: memref<20x8xf32, #tpu.memory_space<vmem>>, %arg4: memref<64x8xf32, #tpu.memory_space<vmem>>, %arg5: memref<8x8xf32, #tpu.memory_space<vmem>>, %arg6: memref<8x1xf32, #tpu.memory_space<vmem>>, %arg7: memref<1x2xf32, #tpu.memory_space<vmem>>) attributes {dimension_semantics = [#tpu.dimension_semantics<parallel>], iteration_bounds = array<i64: 1>, scalar_prefetch = 0 : i64, scratch_operands = 0 : i64, tpu.core_type = #tpu.core_type<tc>, window_params = [{transform_indices = @transform_0, window_bounds = array<i64: 2, 20>}, {transform_indices = @transform_1, window_bounds = array<i64: 2, 64>}, {pipeline_mode = #tpu.pipeline_mode<synchronous>, transform_indices = @transform_2, window_bounds = array<i64: 20, 8>}, {pipeline_mode = #tpu.pipeline_mode<synchronous>, transform_indices = @transform_3, window_bounds = array<i64: 64, 8>}, {pipeline_mode = #tpu.pipeline_mode<synchronous>, transform_indices = @transform_4, window_bounds = array<i64: 8, 8>}, {pipeline_mode = #tpu.pipeline_mode<synchronous>, transform_indices = @transform_5, window_bounds = array<i64: 8, 1>}, {transform_indices = @transform_6, window_bounds = array<i64: 1, 2>}]} {
    %c0 = arith.constant 0 : index
    %c0_0 = arith.constant 0 : index
    %0 = vector.load %arg1[%c0, %c0_0] : memref<2x20xf32, #tpu.memory_space<vmem>>, vector<2x20xf32>
    %c0_1 = arith.constant 0 : index
    %c0_2 = arith.constant 0 : index
    %1 = vector.load %arg3[%c0_1, %c0_2] : memref<20x8xf32, #tpu.memory_space<vmem>>, vector<20x8xf32>
    %cst = arith.constant dense<0.000000e+00> : vector<2x8xf32>
    %2 = tpu.matmul %0, %1, %cst {dimension_numbers = #tpu.dot_dimension_numbers<[1], [0], [0], [1], [0, 0, 1, 1], [], []>, precision = #tpu.contract_precision<fp32>} : vector<2x20xf32>, vector<20x8xf32>, vector<2x8xf32> -> vector<2x8xf32>
    %c0_3 = arith.constant 0 : index
    %c0_4 = arith.constant 0 : index
    %3 = vector.load %arg2[%c0_3, %c0_4] : memref<2x64xf32, #tpu.memory_space<vmem>>, vector<2x64xf32>
    %c0_5 = arith.constant 0 : index
    %c0_6 = arith.constant 0 : index
    %4 = vector.load %arg4[%c0_5, %c0_6] : memref<64x8xf32, #tpu.memory_space<vmem>>, vector<64x8xf32>
    %cst_7 = arith.constant dense<0.000000e+00> : vector<2x8xf32>
    %5 = tpu.matmul %3, %4, %cst_7 {dimension_numbers = #tpu.dot_dimension_numbers<[1], [0], [0], [1], [0, 0, 1, 1], [], []>, precision = #tpu.contract_precision<fp32>} : vector<2x64xf32>, vector<64x8xf32>, vector<2x8xf32> -> vector<2x8xf32>
    %6 = arith.addf %2, %5 : vector<2x8xf32>
    %cst_8 = arith.constant dense<0xFF800000> : vector<2xf32>
    %7 = vector.multi_reduction <maximumf>, %6, %cst_8 [1] : vector<2x8xf32> to vector<2xf32>
    %8 = vector.shape_cast %7 : vector<2xf32> to vector<2x1xf32>
    %9 = vector.broadcast %8 : vector<2x1xf32> to vector<2x8xf32>
    %10 = arith.subf %6, %9 : vector<2x8xf32>
    %11 = math.exp %10 : vector<2x8xf32>
    %c0_9 = arith.constant 0 : index
    %c0_10 = arith.constant 0 : index
    %12 = vector.load %arg5[%c0_9, %c0_10] : memref<8x8xf32, #tpu.memory_space<vmem>>, vector<8x8xf32>
    %cst_11 = arith.constant dense<0.000000e+00> : vector<2x8xf32>
    %13 = tpu.matmul %11, %12, %cst_11 {dimension_numbers = #tpu.dot_dimension_numbers<[1], [0], [0], [1], [0, 0, 1, 1], [], []>, precision = #tpu.contract_precision<fp32>} : vector<2x8xf32>, vector<8x8xf32>, vector<2x8xf32> -> vector<2x8xf32>
    %14 = math.log %13 : vector<2x8xf32>
    %15 = vector.broadcast %8 : vector<2x1xf32> to vector<2x8xf32>
    %16 = arith.addf %15, %14 : vector<2x8xf32>
    %17 = tpu.transpose %16, [1, 0] : vector<2x8xf32> -> vector<8x2xf32>
    %cst_12 = arith.constant dense<0xFF800000> : vector<2xf32>
    %18 = vector.multi_reduction <maximumf>, %17, %cst_12 [0] : vector<8x2xf32> to vector<2xf32>
    %19 = vector.shape_cast %18 : vector<2xf32> to vector<1x2xf32>
    %20 = vector.broadcast %19 : vector<1x2xf32> to vector<8x2xf32>
    %21 = arith.subf %17, %20 : vector<8x2xf32>
    %22 = math.exp %21 : vector<8x2xf32>
    %c0_13 = arith.constant 0 : index
    %c0_14 = arith.constant 0 : index
    %23 = vector.load %arg6[%c0_13, %c0_14] : memref<8x1xf32, #tpu.memory_space<vmem>>, vector<8x1xf32>
    %24 = vector.broadcast %23 : vector<8x1xf32> to vector<8x2xf32>
    %25 = arith.mulf %22, %24 : vector<8x2xf32>
    %cst_15 = arith.constant dense<0.000000e+00> : vector<2xf32>
    %26 = vector.multi_reduction <add>, %25, %cst_15 [0] : vector<8x2xf32> to vector<2xf32>
    %27 = vector.shape_cast %26 : vector<2xf32> to vector<1x2xf32>
    %28 = math.log %27 : vector<1x2xf32>
    %29 = arith.addf %19, %28 : vector<1x2xf32>
    %c0_16 = arith.constant 0 : index
    %c0_17 = arith.constant 0 : index
    %30 = vector.load %arg7[%c0_16, %c0_17] : memref<1x2xf32, #tpu.memory_space<vmem>>, vector<1x2xf32>
    tpu.vector_store %arg7[%c0_16, %c0_17], %29 {strides = array<i32>} : memref<1x2xf32, #tpu.memory_space<vmem>>, vector<1x2xf32>,
    return
  }
  func.func @transform_0(%arg0: i32) -> (i32, i32) {
    %c0_i32 = arith.constant 0 : i32
    %c0_i32_0 = arith.constant 0 : i32
    return %arg0, %c0_i32 : i32, i32
  }
  func.func @transform_1(%arg0: i32) -> (i32, i32) {
    %c0_i32 = arith.constant 0 : i32
    %c0_i32_0 = arith.constant 0 : i32
    return %arg0, %c0_i32 : i32, i32
  }
  func.func @transform_2(%arg0: i32) -> (i32, i32) {
    %c0_i32 = arith.constant 0 : i32
    %c0_i32_0 = arith.constant 0 : i32
    %c0_i32_1 = arith.constant 0 : i32
    return %c0_i32, %c0_i32_0 : i32, i32
  }
  func.func @transform_3(%arg0: i32) -> (i32, i32) {
    %c0_i32 = arith.constant 0 : i32
    %c0_i32_0 = arith.constant 0 : i32
    %c0_i32_1 = arith.constant 0 : i32
    return %c0_i32, %c0_i32_0 : i32, i32
  }
  func.func @transform_4(%arg0: i32) -> (i32, i32) {
    %c0_i32 = arith.constant 0 : i32
    %c0_i32_0 = arith.constant 0 : i32
    %c0_i32_1 = arith.constant 0 : i32
    return %c0_i32, %c0_i32_0 : i32, i32
  }
  func.func @transform_5(%arg0: i32) -> (i32, i32) {
    %c0_i32 = arith.constant 0 : i32
    %c0_i32_0 = arith.constant 0 : i32
    %c0_i32_1 = arith.constant 0 : i32
    return %c0_i32, %c0_i32_0 : i32, i32
  }
  func.func @transform_6(%arg0: i32) -> (i32, i32) {
    %c0_i32 = arith.constant 0 : i32
    %c0_i32_0 = arith.constant 0 : i32
    return %c0_i32, %arg0 : i32, i32
  }
}

</mosaic_0001>

<bundles_post_ra>
// kernel: tpu_custom_call.1
= control target key start
LH: loop header
LB: loop body
LE: loop exit
PB: predicated region body
PF: predicated region fallthrough
CT: control target
= control target key end

     0   :  { %vm37_vm0 = vcmask 523264   ;;  %v1919_v3 = vmov 0.0   ;;  %vm1920_vm1 = vmmov 0   ;;  %s2294_s0 = inlined_call_operand.vmem [shape: f32[2,20], index: 0, kind: input, shape index: {}]   ;;  %s2295_s1 = inlined_call_operand.vmem [shape: f32[2,64], index: 1, kind: input, shape index: {}]   ;;  %s2296_s2 = inlined_call_operand.vmem [shape: f32[20,8], index: 2, kind: input, shape index: {}]   ;;  %s2297_s3 = inlined_call_operand.vmem [shape: f32[64,8], index: 3, kind: input, shape index: {}]   ;;  %s2298_s4 = inlined_call_operand.vmem [shape: f32[8,8], index: 4, kind: input, shape index: {}]   ;;  %s2299_s5 = inlined_call_operand.vmem [shape: f32[8,1], index: 5, kind: input, shape index: {}]   ;;  %s2300_s6 = inlined_call_operand.hbm [shape: f32[1,2], index: 6, kind: output, shape index: {}]  }
   0x1   :  { %v36_v0 = vld [vmem:[%s2297_s3 + $0x38] sm:$0xff]  ;;  %v35_v1 = vld [vmem:[%s2297_s3 + $0x30] sm:$0xff]  ;;  %v34_v2 = vld [vmem:[%s2297_s3 + $0x28] sm:$0xff]  ;;  %1685 = vmatprep.subr.mxu0 %v1919_v3  ;;  %1704 = vmatprep.subr.mxu1 %v1919_v3 }
   0x2   :  { %v1968_v4 = vand.u32 4294901760, %v36_v0  ;;  %v1970_v5 = vand.u32 4294901760, %v35_v1  ;;  %v1972_v6 = vand.u32 4294901760, %v34_v2  ;;  %v33_v7 = vld [vmem:[%s2297_s3 + $0x20] sm:$0xff]  ;;  %v32_v8 = vld [vmem:[%s2297_s3 + $0x18] sm:$0xff]  ;;  %v31_v9 = vld [vmem:[%s2297_s3 + $0x10] sm:$0xff]  ;;  %1701 = vmatprep.mubr.msk.f32.mxu0 %vm1920_vm1, %v1919_v3  ;;  %1720 = vmatprep.mubr.msk.f32.mxu1 %vm1920_vm1, %v1919_v3 }
   0x3   :  { %v1984_v10 = vand.u32 4294901760, %v33_v7  ;;  %v1986_v11 = vand.u32 4294901760, %v32_v8  ;;  %v1988_v12 = vand.u32 4294901760, %v31_v9  ;;  %v30_v13 = vld [vmem:[%s2297_s3 + $0x8] sm:$0xff]  ;;  %v29_v14 = vld [vmem:[%s2297_s3] sm:$0xff] }
   0x4   :  { %1686 = vmatpush3.msra.mxu0 %v1968_v4  ;;  %v2002_v15 = vsub.f32 %v36_v0, %v1968_v4  ;;  %v2005_v16 = vsub.f32 %v35_v1, %v1970_v5  ;;  %v2007_v17 = vand.u32 4294901760, %v30_v13  ;;  %v2010_v18 = vsub.f32 %v34_v2, %v1972_v6  ;;  %v28_v19 = vld [vmem:[%s2295_s1] sm:$0x3] }
   0x5   :  { %1687 = vmatprep.subr.mxu0 %v1919_v3  ;;  %v2016_v20 = vand.u32 4294901760, %v29_v14  ;;  %v2019_v21 = vsub.f32 %v33_v7, %v1984_v10  ;;  %v39_v22 = vsel %vm37_vm0, %v28_v19, 0  ;;  %v2023_v23 = vsub.f32 %v32_v8, %v1986_v11 }
   0x6   :  { %1688 = vmatpush3.msra.mxu0 %v1970_v5  ;;  %v143_v24 = vand.u32 4294901760, %v2002_v15  ;;  %v150_v25 = vand.u32 4294901760, %v2005_v16  ;;  %v157_v26 = vand.u32 4294901760, %v2010_v18  ;;  %v2029_v27 = vand.u32 4294901760, %v39_v22 }
   0x7   :  { %11 = vsyncpa [#allocation3], 0  ;;  %1689 = vmatprep.subr.mxu0 %v1919_v3  ;;  %v164_v28 = vand.u32 4294901760, %v2019_v21  ;;  %v171_v29 = vand.u32 4294901760, %v2023_v23  ;;  %v2035_v30 = vsub.f32 %v31_v9, %v1988_v12  ;;  %v2038_v31 = vsub.f32 %v30_v13, %v2007_v17  ;;  %v27_v56 = vld [vmem:[%s2296_s2 + $0x10] sm:$0xf] }
   0x8   :  { %1690 = vmatpush3.msra.mxu0 %v1972_v6  ;;  %v144_v32 = vsub.f32 %v2002_v15, %v143_v24  ;;  %v151_v33 = vsub.f32 %v2005_v16, %v150_v25  ;;  %v158_v34 = vsub.f32 %v2010_v18, %v157_v26  ;;  %v2051_v35 = vsub.f32 %v39_v22, %v2029_v27  ;;  %v24_v57 = vld [vmem:[%s2294_s0] sm:$0x3]  ;;  %v26_v60 = vld [vmem:[%s2296_s2 + $0x8] sm:$0xff] }
   0x9   :  { %1691 = vmatprep.subr.mxu0 %v1919_v3  ;;  %v165_v36 = vsub.f32 %v2019_v21, %v164_v28  ;;  %v178_v40 = vand.u32 4294901760, %v2035_v30  ;;  %v172_v41 = vsub.f32 %v2023_v23, %v171_v29  ;;  %v185_v44 = vand.u32 4294901760, %v2038_v31  ;;  %v25_v63 = vld [vmem:[%s2296_s2] sm:$0xff] }
   0xa   :  { %1692 = vmatpush3.msra.mxu0 %v1984_v10  ;;  %v145_v37 = vand.u32 4294901760, %v144_v32  ;;  %v152_v38 = vand.u32 4294901760, %v151_v33  ;;  %v116_v39 = vand.u32 4294901760, %v2051_v35  ;;  %v159_v42 = vand.u32 4294901760, %v158_v34 }
   0xb   :  { %1693 = vmatprep.subr.mxu0 %v1919_v3  ;;  %v2070_v45 = vsub.f32 %v29_v14, %v2016_v20  ;;  %v166_v46 = vand.u32 4294901760, %v165_v36  ;;  %v179_v47 = vsub.f32 %v2035_v30, %v178_v40  ;;  %v173_v50 = vand.u32 4294901760, %v172_v41 }
   0xc   :  { %1694 = vmatpush3.msra.mxu0 %v1986_v11  ;;  %1705 = vmatpush3.msra.mxu1 %v145_v37  ;;  %v117_v43 = vsub.f32 %v2051_v35, %v116_v39  ;;  %v186_v51 = vsub.f32 %v2038_v31, %v185_v44  ;;  %vm582_vm2 = vcmask 1043456   ;;  %vm578_vm3 = vcmask 162816  }
   0xd   :  { %1695 = vmatprep.subr.mxu0 %v1919_v3  ;;  %1706 = vmatprep.subr.mxu1 %v1919_v3  ;;  %v192_v48 = vand.u32 4294901760, %v2070_v45  ;;  %v180_v52 = vand.u32 4294901760, %v179_v47  ;;  %v584_v58 = vsel %vm582_vm2, %v27_v56, 0  ;;  %v580_v59 = vsel %vm578_vm3, %v24_v57, 0 }
   0xe   :  { %1696 = vmatpush3.msra.mxu0 %v1988_v12  ;;  %1707 = vmatpush3.msra.mxu1 %v152_v38  ;;  %v118_v49 = vand.u32 4294901760, %v117_v43  ;;  %v187_v54 = vand.u32 4294901760, %v186_v51  ;;  %v2152_v61 = vand.u32 4294901760, %v584_v58  ;;  %v2154_v62 = vand.u32 4294901760, %v580_v59 }
   0xf   :  { %1697 = vmatprep.subr.mxu0 %v1919_v3  ;;  %1708 = vmatprep.subr.mxu1 %v1919_v3  ;;  %v193_v53 = vsub.f32 %v2070_v45, %v192_v48  ;;  %v2165_v0 = vand.u32 4294901760, %v26_v60  ;;  %v2175_v2 = vand.u32 4294901760, %v25_v63  ;;  %vm1058_vm4 = vcmask 58368  }
  0x10   :  { %1698 = vmatpush3.msra.mxu0 %v2007_v17  ;;  %1709 = vmatpush3.msra.mxu1 %v159_v42  ;;  %v2173_v1 = vsub.f32 %v584_v58, %v2152_v61  ;;  %v2178_v7 = vsub.f32 %v580_v59, %v2154_v62  ;;  %vm1066_vm5 = vcmask 64512   ;;  %vm1551_vm6 = vcmask 15360  }
  0x11   :  { %1699 = vmatprep.subr.mxu0 %v1919_v3  ;;  %1710 = vmatprep.subr.mxu1 %v1919_v3  ;;  %v194_v55 = vand.u32 4294901760, %v193_v53  ;;  %v2194_v8 = vsub.f32 %v25_v63, %v2175_v2  ;;  %vm1579_vm7 = vcmask 8192  }
  0x12   :  { %1700 = vmatpush3.msra.mxu0 %v2016_v20  ;;  %1711 = vmatpush3.msra.mxu1 %v166_v46  ;;  %v656_v9 = vand.u32 4294901760, %v2178_v7 }
  0x13   :  { %1712 = vmatprep.subr.mxu1 %v1919_v3  ;;  %1723 = vmatprep.subr.mxu0 %v1919_v3 }
  0x14   :  { %1702 = vmatmul.mubr.f32.vlgmr.msra.gmra.mxu0 %v118_v49  ;;  %1713 = vmatpush3.msra.mxu1 %v173_v50  ;;  %v657_v14 = vsub.f32 %v2178_v7, %v656_v9 }
  0x15   :  { %1724 = vmatpush3.msra.mxu0 %v2002_v15  ;;  %1714 = vmatprep.subr.mxu1 %v1919_v3  ;;  %v707_v15 = vand.u32 4294901760, %v2194_v8 }
  0x16   :  { %1725 = vmatprep.subr.mxu0 %v1919_v3  ;;  %1715 = vmatpush3.msra.mxu1 %v180_v52 }
  0x17   :  { %1726 = vmatpush3.msra.mxu0 %v2005_v16  ;;  %1716 = vmatprep.subr.mxu1 %v1919_v3  ;;  %v658_v16 = vand.u32 4294901760, %v657_v14 }
  0x18   :  { %1727 = vmatprep.subr.mxu0 %v1919_v3  ;;  %1717 = vmatpush3.msra.mxu1 %v187_v54 }
  0x19   :  { %1728 = vmatpush3.msra.mxu0 %v2010_v18  ;;  %1718 = vmatprep.subr.mxu1 %v1919_v3  ;;  %v708_v18 = vsub.f32 %v2194_v8, %v707_v15 }
  0x1a   :  { %1729 = vmatprep.subr.mxu0 %v1919_v3  ;;  %1719 = vmatpush3.msra.mxu1 %v194_v55  ;;  %v1065_v55 = vld [vmem:[%s2298_s4] sm:$0xff] }
  0x1b   :  { %1730 = vmatpush3.msra.mxu0 %v2019_v21  ;;  %1721 = vmatmul.mubr.f32.vlgmr.msra.gmra.mxu1 %v2029_v27  ;;  %v1101_v56 = vand.u32 4294901760, %v1065_v55 }
  0x1c   :  { %1731 = vmatprep.subr.mxu0 %v1919_v3  ;;  %1742 = vmatprep.subr.mxu1 %v1919_v3 }
  0x1d   :  { %1732 = vmatpush3.msra.mxu0 %v2023_v23  ;;  %1743 = vmatpush3.msra.mxu1 %v1968_v4  ;;  %v1178_v57 = vsub.f32 %v1065_v55, %v1101_v56 }
  0x1e   :  { %1733 = vmatprep.subr.mxu0 %v1919_v3  ;;  %1744 = vmatprep.subr.mxu1 %v1919_v3 }
  0x1f   :  { %1734 = vmatpush3.msra.mxu0 %v2035_v30  ;;  %1745 = vmatpush3.msra.mxu1 %v1970_v5  ;;  %v1179_v58 = vand.u32 4294901760, %v1178_v57 }
  0x20   :  { %1735 = vmatprep.subr.mxu0 %v1919_v3  ;;  %1746 = vmatprep.subr.mxu1 %v1919_v3 }
  0x21   :  { %1736 = vmatpush3.msra.mxu0 %v2038_v31  ;;  %1747 = vmatpush3.msra.mxu1 %v1972_v6  ;;  %v1180_v59 = vsub.f32 %v1178_v57, %v1179_v58 }
  0x22   :  { %1737 = vmatprep.subr.mxu0 %v1919_v3  ;;  %1748 = vmatprep.subr.mxu1 %v1919_v3 }
  0x23   :  { %1738 = vmatpush3.msra.mxu0 %v2070_v45  ;;  %1739 = vmatprep.mubr.msk.f32.mxu0 %vm1920_vm1, %v1919_v3 }
  0x24   :  { %1749 = vmatpush3.msra.mxu1 %v1984_v10  ;;  %1740 = vmatmul.mubr.f32.vlgmr.msra.gmra.mxu0 %v2051_v35 }
  0x25   :  { %1750 = vmatprep.subr.mxu1 %v1919_v3  ;;  %1761 = vmatprep.subr.mxu0 %v1919_v3 }
  0x26   :  { %1751 = vmatpush3.msra.mxu1 %v1986_v11  ;;  %1762 = vmatpush3.msra.mxu0 %v143_v24 }
  0x27   :  { %1752 = vmatprep.subr.mxu1 %v1919_v3  ;;  %1763 = vmatprep.subr.mxu0 %v1919_v3 }
  0x28   :  { %1753 = vmatpush3.msra.mxu1 %v1988_v12  ;;  %1764 = vmatpush3.msra.mxu0 %v150_v25 }
  0x29   :  { %1754 = vmatprep.subr.mxu1 %v1919_v3  ;;  %1765 = vmatprep.subr.mxu0 %v1919_v3 }
  0x2a   :  { %1755 = vmatpush3.msra.mxu1 %v2007_v17  ;;  %1766 = vmatpush3.msra.mxu0 %v157_v26 }
  0x2b   :  { %1756 = vmatprep.subr.mxu1 %v1919_v3  ;;  %1767 = vmatprep.subr.mxu0 %v1919_v3 }
  0x2c   :  { %1757 = vmatpush3.msra.mxu1 %v2016_v20  ;;  %1758 = vmatprep.mubr.msk.f32.mxu1 %vm1920_vm1, %v1919_v3 }
  0x2d   :  { %1768 = vmatpush3.msra.mxu0 %v164_v28  ;;  %1759 = vmatmul.mubr.f32.vlgmr.msra.gmra.mxu1 %v116_v39 }
  0x2e   :  { %1769 = vmatprep.subr.mxu0 %v1919_v3  ;;  %1780 = vmatprep.subr.mxu1 %v1919_v3 }
  0x2f   :  { %1770 = vmatpush3.msra.mxu0 %v171_v29  ;;  %1781 = vmatpush3.msra.mxu1 %v1968_v4  ;;  %v2186_v4 = vsub.f32 %v26_v60, %v2165_v0  ;;  %v1181_v60 = vand.u32 4294901760, %v1180_v59 }
  0x30   :  { %1771 = vmatprep.subr.mxu0 %v1919_v3  ;;  %1782 = vmatprep.subr.mxu1 %v1919_v3 }
  0x31   :  { %1772 = vmatpush3.msra.mxu0 %v178_v40  ;;  %1783 = vmatpush3.msra.mxu1 %v1970_v5  ;;  %v693_v5 = vand.u32 4294901760, %v2173_v1 }
  0x32   :  { %1773 = vmatprep.subr.mxu0 %v1919_v3  ;;  %1784 = vmatprep.subr.mxu1 %v1919_v3 }
  0x33   :  { %1774 = vmatpush3.msra.mxu0 %v185_v44  ;;  %1785 = vmatpush3.msra.mxu1 %v1972_v6  ;;  %v700_v6 = vand.u32 4294901760, %v2186_v4  ;;  %v694_v13 = vsub.f32 %v2173_v1, %v693_v5 }
  0x34   :  { %1775 = vmatprep.subr.mxu0 %v1919_v3  ;;  %1786 = vmatprep.subr.mxu1 %v1919_v3 }
  0x35   :  { %1776 = vmatpush3.msra.mxu0 %v192_v48  ;;  %1777 = vmatprep.mubr.msk.f32.mxu0 %vm1920_vm1, %v1919_v3 }
  0x36   :  { %1787 = vmatpush3.msra.mxu1 %v1984_v10  ;;  %1778 = vmatmul.mubr.f32.vlgmr.msra.gmra.mxu0 %v2029_v27  ;;  %v701_v10 = vsub.f32 %v2186_v4, %v700_v6 }
  0x37   :  { %1788 = vmatprep.subr.mxu1 %v1919_v3  ;;  %1799 = vmatprep.subr.mxu0 %v1919_v3 }
  0x38   :  { %1789 = vmatpush3.msra.mxu1 %v1986_v11  ;;  %1800 = vmatpush3.msra.mxu0 %v2152_v61  ;;  %v695_v11 = vand.u32 4294901760, %v694_v13 }
  0x39   :  { %1790 = vmatprep.subr.mxu1 %v1919_v3  ;;  %1801 = vmatprep.subr.mxu0 %v1919_v3 }
  0x3a   :  { %1791 = vmatpush3.msra.mxu1 %v1988_v12  ;;  %1796 = vmatprep.mubr.msk.f32.mxu1 %vm1920_vm1, %v1919_v3  ;;  %v702_v12 = vand.u32 4294901760, %v701_v10 }
  0x3b   :  { %1792 = vmatprep.subr.mxu1 %v1919_v3  ;;  %1802 = vmatpush3.msra.mxu0 %v2165_v0 }
  0x3c   :  { %1793 = vmatpush3.msra.mxu1 %v2007_v17  ;;  %1803 = vmatprep.subr.mxu0 %v1919_v3  ;;  %v709_v17 = vand.u32 4294901760, %v708_v18 }
  0x3d   :  { %1794 = vmatprep.subr.mxu1 %v1919_v3  ;;  %1804 = vmatpush3.msra.mxu0 %v2175_v2 }
  0x3e   :  { %1795 = vmatpush3.msra.mxu1 %v2016_v20  ;;  %1805 = vmatprep.mubr.msk.f32.mxu0 %vm1920_vm1, %v1919_v3 }
  0x3f   :  { %1797 = vmatmul.mubr.f32.vlgmr.msra.gmra.mxu1 %v2029_v27  ;;  %1808 = vmatprep.subr.mxu1 %v1919_v3 }
  0x40   :  { %1809 = vmatpush3.msra.mxu1 %v695_v11  ;;  %1806 = vmatmul.mubr.f32.vlgmr.msra.gmra.mxu0 %v658_v16 }
  0x41   :  { %1810 = vmatprep.subr.mxu1 %v1919_v3  ;;  %1817 = vmatprep.subr.mxu0 %v1919_v3 }
  0x42   :  { %1811 = vmatpush3.msra.mxu1 %v702_v12  ;;  %1818 = vmatpush3.msra.mxu0 %v2173_v1 }
  0x43   :  { %1812 = vmatprep.subr.mxu1 %v1919_v3  ;;  %1819 = vmatprep.subr.mxu0 %v1919_v3 }
  0x44   :  { %1813 = vmatpush3.msra.mxu1 %v709_v17  ;;  %1814 = vmatprep.mubr.msk.f32.mxu1 %vm1920_vm1, %v1919_v3 }
  0x45   :  { %1820 = vmatpush3.msra.mxu0 %v2186_v4  ;;  %1815 = vmatmul.mubr.f32.vlgmr.msra.gmra.mxu1 %v2154_v62 }
  0x46   :  { %1821 = vmatprep.subr.mxu0 %v1919_v3  ;;  %1826 = vmatprep.subr.mxu1 %v1919_v3 }
  0x47   :  { %1822 = vmatpush3.msra.mxu0 %v2194_v8  ;;  %1823 = vmatprep.mubr.msk.f32.mxu0 %vm1920_vm1, %v1919_v3 }
  0x48   :  { %1827 = vmatpush3.msra.mxu1 %v2152_v61  ;;  %1824 = vmatmul.mubr.f32.vlgmr.msra.gmra.mxu0 %v2178_v7 }
  0x49   :  { %1828 = vmatprep.subr.mxu1 %v1919_v3  ;;  %1835 = vmatprep.subr.mxu0 %v1919_v3 }
  0x4a   :  { %1829 = vmatpush3.msra.mxu1 %v2165_v0  ;;  %1836 = vmatpush3.msra.mxu0 %v693_v5 }
  0x4b   :  { %1830 = vmatprep.subr.mxu1 %v1919_v3  ;;  %1837 = vmatprep.subr.mxu0 %v1919_v3 }
  0x4c   :  { %1831 = vmatpush3.msra.mxu1 %v2175_v2  ;;  %1832 = vmatprep.mubr.msk.f32.mxu1 %vm1920_vm1, %v1919_v3 }
  0x4d   :  { %1838 = vmatpush3.msra.mxu0 %v700_v6  ;;  %1833 = vmatmul.mubr.f32.vlgmr.msra.gmra.mxu1 %v656_v9  ;;  %v1562_v9 = vld [vmem:[%s2299_s5] sm:$0xff]  ;;  %v1921_v6 = vmov 0   ;;  %s1922_s5 = smov [#allocation2]  }
  0x4e   :  { %1839 = vmatprep.subr.mxu0 %v1919_v3  ;;  %1844 = vmatprep.subr.mxu1 %v1919_v3  ;;  %s1587_s22 = sshll.u32 %s1922_s5, 4  ;;  %s1588_s22 = int_to_ptr.vmem [resolvable:$true] %s1587_s22 }
  0x4f   :  { %1840 = vmatpush3.msra.mxu0 %v707_v15  ;;  %1841 = vmatprep.mubr.msk.f32.mxu0 %vm1920_vm1, %v1919_v3  ;;  %s1897_s23 = scalar_lea.vmem %s1588_s22, 16  ;;  %s1901_s24 = scalar_lea.vmem %s1588_s22, 32 }
  0x50   :  { %1845 = vmatpush3.msra.mxu1 %v2152_v61  ;;  %1842 = vmatmul.mubr.f32.vlgmr.msra.gmra.mxu0 %v2154_v62  ;;  %p1898_p0 = scmp.ne.s32.totalorder %s1588_s22, %s1897_s23  ;;  %p1902_p1 = scmp.lt.s32.totalorder %s1588_s22, %s1588_s22 }
  0x51   :  { %1846 = vmatprep.subr.mxu1 %v1919_v3  ;;  %1850 = vmatprep.mubr.msk.f32.mxu1 %vm1920_vm1, %v1919_v3  ;;  %p1903_p2 = scmp.lt.s32.totalorder %s1901_s24, %s1897_s23 }
  0x52   :  { %1847 = vmatpush3.msra.mxu1 %v2165_v0  ;;  %1853 = vmatprep.subr.mxu0 %v1919_v3 }
  0x53   :  { %1848 = vmatprep.subr.mxu1 %v1919_v3  ;;  %1855 = vmatprep.mubr.msk.f32.mxu0 %vm1920_vm1, %v1919_v3  ;;  %p1904_p3 = por %p1903_p2, %p1902_p1 }
  0x54   :  { %1849 = vmatpush3.msra.mxu1 %v2175_v2  ;;  %1854 = vmatpush3.msra.mxu0 %v1101_v56 }
  0x55   :  { %1851 = vmatmul.mubr.f32.vlgmr.msra.gmra.mxu1 %v2154_v62  ;;  %1858 = vmatprep.subr.mxu1 %v1919_v3  ;;  %p1905_p4 = pnand %p1904_p3, %p1898_p0 }
  0x56   :  { %1860 = vmatprep.mubr.msk.f32.mxu1 %vm1920_vm1, %v1919_v3  ;;  %1863 = vmatprep.subr.mxu0 %v1919_v3 }
  0x57   :  { %1859 = vmatpush3.msra.mxu1 %v1181_v60  ;;  %1887 = vset.pattern.permute.xlu1 %v1921_v6 }
  0x58   :  { %1868 = vmatprep.subr.mxu1 %v1919_v3  ;;  %1565 = vperm.xlu1 %1887, %v1562_v9  }
  0xd4   :  { %v120_v19 = vpop.f32.mrf.mxu0 }
  0xd6   :  { %v1703_v20 = vpop.f32.mrf.mxu0 }
  0xdb   :  { %v231_v21 = vpop.f32.mrf.mxu1 }
  0xdc   :  { %v232_v29 = vadd.f32 %v231_v21, %v120_v19 }
  0xdd   :  { %v1722_v22 = vpop.f32.mrf.mxu1 }
  0xe4   :  { %v319_v23 = vpop.f32.mrf.mxu0 }
  0xe5   :  { %v320_v30 = vadd.f32 %v319_v23, %v232_v29 }
  0xe6   :  { %v1741_v24 = vpop.f32.mrf.mxu0 }
  0xed   :  { %v400_v25 = vpop.f32.mrf.mxu1 }
  0xee   :  { %v401_v32 = vadd.f32 %v400_v25, %v320_v30 }
  0xef   :  { %v1760_v26 = vpop.f32.mrf.mxu1 }
  0xf6   :  { %v495_v27 = vpop.f32.mrf.mxu0 }
  0xf7   :  { %v496_v35 = vadd.f32 %v495_v27, %v401_v32 }
  0xf8   :  { %v1779_v28 = vpop.f32.mrf.mxu0 }
  0xff   :  { %v574_v31 = vpop.f32.mrf.mxu1 }
 0x100   :  { %v660_v33 = vpop.f32.mrf.mxu0  ;;  %v575_v37 = vadd.f32 %v574_v31, %v496_v35 }
 0x101   :  { %v1798_v34 = vpop.f32.mrf.mxu1 }
 0x102   :  { %v1807_v36 = vpop.f32.mrf.mxu0  ;;  %v661_v40 = vadd.f32 %v660_v33, %v575_v37 }
 0x105   :  { %v746_v38 = vpop.f32.mrf.mxu1 }
 0x106   :  { %v747_v42 = vadd.f32 %v746_v38, %v661_v40 }
 0x107   :  { %v1816_v39 = vpop.f32.mrf.mxu1 }
 0x108   :  { %v824_v41 = vpop.f32.mrf.mxu0  ;;  %v1566_v39 = vpop.permute.xlu1 %1565 }
 0x109   :  { %v825_v45 = vadd.f32 %v824_v41, %v747_v42 }
 0x10a   :  { %v1825_v43 = vpop.f32.mrf.mxu0 }
 0x10d   :  { %v900_v44 = vpop.f32.mrf.mxu1 }
 0x10e   :  { %v901_v47 = vadd.f32 %v900_v44, %v825_v45 }
 0x10f   :  { %v1834_v46 = vpop.f32.mrf.mxu1 }
 0x110   :  { %v980_v48 = vpop.f32.mrf.mxu0 }
 0x111   :  { %v981_v50 = vadd.f32 %v980_v48, %v901_v47 }
 0x112   :  { %v1843_v49 = vpop.f32.mrf.mxu0 }
 0x115   :  { %v1054_v51 = vpop.f32.mrf.mxu1 }
 0x116   :  { %v1055_v52 = vadd.f32 %v1054_v51, %v981_v50 }
 0x117   :  { %v1852_v53 = vpop.f32.mrf.mxu1 }
 0x118   :  { %v1059_v54 = vsel %vm1058_vm4, %v1055_v52, -inf }
 0x119   :  { %1060 = vmax.xlane.f32.xlu0 %v1059_v54 }
 0x1a2   :  { %v1061_v61 = vpop.xlane.xlu0 %1060 }
 0x1a3   :  { %v1062_v62 = vsub.f32 %v1055_v52, %v1061_v61 }
 0x1a5   :  { %v1063_v63 = vmul.f32 1.442695, %v1062_v62 }
 0x1a7   :  { %1889 = vpow2.f32 %v1063_v63 }
 0x1b4   :  { %v1890_v0 = vpop.eup %1889 }
 0x1b5   :  { %v1068_v1 = vsel %vm1066_vm5, %v1890_v0, 0 }
 0x1b6   :  { %v1136_v2 = vand.u32 4294901760, %v1068_v1 }
 0x1b8   :  { %v1137_v7 = vsub.f32 %v1068_v1, %v1136_v2  ;;  %1861 = vmatmul.mubr.f32.vlgmr.msra.gmra.mxu1 %v1136_v2 }
 0x1b9   :  { %1869 = vmatpush3.msra.mxu1 %v1101_v56  ;;  %1870 = vmatprep.mubr.msk.f32.mxu1 %vm1920_vm1, %v1919_v3 }
 0x1ba   :  { %v1138_v4 = vand.u32 4294901760, %v1137_v7  ;;  %1878 = vmatprep.subr.mxu1 %v1919_v3 }
 0x1bc   :  { %1871 = vmatmul.mubr.f32.vlgmr.msra.gmra.mxu1 %v1138_v4  ;;  %v1139_v8 = vsub.f32 %v1137_v7, %v1138_v4 }
 0x1bd   :  { %1879 = vmatpush3.msra.mxu1 %v1101_v56  ;;  %1880 = vmatprep.mubr.msk.f32.mxu1 %vm1920_vm1, %v1919_v3 }
 0x1be   :  { %v1140_v5 = vand.u32 4294901760, %v1139_v8 }
 0x1c0   :  { %1856 = vmatmul.mubr.f32.vlgmr.msra.gmra.mxu0 %v1140_v5  ;;  %1881 = vmatmul.mubr.f32.vlgmr.msra.gmra.mxu1 %v1136_v2 }
 0x1c1   :  { %1864 = vmatpush3.msra.mxu0 %v1178_v57  ;;  %1865 = vmatprep.mubr.msk.f32.mxu0 %vm1920_vm1, %v1919_v3 }
 0x1c2   :  { %1873 = vmatprep.subr.mxu0 %v1919_v3 }
 0x1c4   :  { %1866 = vmatmul.mubr.f32.vlgmr.msra.gmra.mxu0 %v1137_v7 }
 0x1c5   :  { %1874 = vmatpush3.msra.mxu0 %v1179_v58  ;;  %1875 = vmatprep.mubr.msk.f32.mxu0 %vm1920_vm1, %v1919_v3 }
 0x1c8   :  { %1876 = vmatmul.mubr.f32.vlgmr.msra.gmra.mxu0 %v1136_v2 }
 0x278   :  { %v1218_v13 = vpop.f32.mrf.mxu1 }
 0x27a   :  { %v1862_v14 = vpop.f32.mrf.mxu1 }
 0x27c   :  { %v1366_v15 = vpop.f32.mrf.mxu1 }
 0x27e   :  { %v1872_v10 = vpop.f32.mrf.mxu1 }
 0x280   :  { %v1142_v11 = vpop.f32.mrf.mxu0  ;;  %v1512_v16 = vpop.f32.mrf.mxu1 }
 0x281   :  { %v1219_v17 = vadd.f32 %v1218_v13, %v1142_v11 }
 0x282   :  { %v1857_v18 = vpop.f32.mrf.mxu0  ;;  %v1882_v12 = vpop.f32.mrf.mxu1 }
 0x284   :  { %v1292_v19 = vpop.f32.mrf.mxu0 }
 0x285   :  { %v1293_v20 = vadd.f32 %v1292_v19, %v1219_v17 }
 0x286   :  { %v1867_v3 = vpop.f32.mrf.mxu0 }
 0x287   :  { %v1367_v21 = vadd.f32 %v1366_v15, %v1293_v20 }
 0x288   :  { %v1440_v22 = vpop.f32.mrf.mxu0 }
 0x289   :  { %v1441_v23 = vadd.f32 %v1440_v22, %v1367_v21 }
 0x28a   :  { %v1877_v24 = vpop.f32.mrf.mxu0 }
 0x28b   :  { %v1513_v25 = vadd.f32 %v1512_v16, %v1441_v23 }
 0x28d   :  { %1891 = vlog2.f32 %v1513_v25 }
 0x29a   :  { %v1892_v26 = vpop.eup %1891 }
 0x29b   :  { %v1517_v27 = vmul.f32 0.6931472, %v1892_v26 }
 0x29d   :  { %v1518_v28 = vadd.f32 %v1517_v27, %v1061_v61 }
 0x29f   :  { %1519 = vxpose.xlu0.b32.start.end [1/1] (short) (narrow) %v1518_v28, 8 }
 0x2c8   :  { %1888 = vset.pattern.permute.xlu0 %v1921_v6 }
 0x31b   :  { %v1535_v29 = vpop.trf.xlu0 }
 0x31c   :  { %v1552_v30 = vsel %vm1551_vm6, %v1535_v29, -inf }
 0x31d   :  { %v1553_v31 = vrot.slane %v1552_v30, 4 }
 0x31f   :  { %v1554_v32 = vmax.f32 %v1552_v30, %v1553_v31 }
 0x321   :  { %v1555_v33 = vrot.slane %v1554_v32, 2 }
 0x323   :  { %v1556_v34 = vmax.f32 %v1554_v32, %v1555_v33 }
 0x325   :  { %v1557_v35 = vrot.slane %v1556_v34, 1 }
 0x327   :  { %v1558_v36 = vmax.f32 %v1556_v34, %v1557_v35 }
 0x329   :  { %v1559_v37 = vsub.f32 %v1535_v29, %v1558_v36 }
 0x32b   :  { %v1560_v38 = vmul.f32 1.442695, %v1559_v37 }
 0x32d   :  { %1893 = vpow2.f32 %v1560_v38 }
 0x33a   :  { %v1894_v40 = vpop.eup %1893 }
 0x33b   :  { %v1568_v41 = vmul.f32 %v1894_v40, %v1566_v39 }
 0x33d   :  { %v1569_v42 = vsel %vm1551_vm6, %v1568_v41, 0.0 }
 0x33e   :  { %v1570_v43 = vrot.slane %v1569_v42, 4 }
 0x340   :  { %v1571_v44 = vadd.f32 %v1570_v43, %v1569_v42 }
 0x342   :  { %v1572_v45 = vrot.slane %v1571_v44, 2 }
 0x344   :  { %v1573_v46 = vadd.f32 %v1572_v45, %v1571_v44 }
 0x346   :  { %v1574_v47 = vrot.slane %v1573_v46, 1 }
 0x348   :  { %v1575_v48 = vadd.f32 %v1574_v47, %v1573_v46 }
 0x34a   :  { %1895 = vlog2.f32 %v1575_v48 }
 0x357   :  { %v1896_v49 = vpop.eup %1895 }
 0x358   :  { %v1577_v50 = vmul.f32 0.6931472, %v1896_v49 }
 0x35a   :  { %v1578_v51 = vadd.f32 %v1577_v50, %v1558_v36 }
 0x35c   :  { %1580 = vst.msk [vmem:[#allocation2] sm:$0x1] %vm1579_vm7, %v1578_v51 }
 0x35d   :  { %1908 = shalt.err (!%p1905_p4)
}
 0x35e   :  { %1590 = dma.vmem_to_hbm [thread:$0]  %s1588_s22, 16, %s2300_s6, [#allocation3]  }
 0x35f   :  { %1917 = dma.done.wait [#allocation3], 16  }
 0x360   :  { %1918 = vsyncadd [#allocation3], 4294967280 }
 0x361   :  { %1594 = vsyncpa [#allocation3], 1 }

</bundles_post_ra>
